<compile_context>
chip_gen: v7x
topology: tpu7x:2x2x1
jax: 0.10.0
libtpu: 0.0.40
codegen_flags: <defaults>
</compile_context>

<pallas_src>
import jax
import jax.numpy as jnp
from jax.experimental import pallas as pl
from jax.experimental.pallas import tpu as pltpu

N_STATES = 8
HIDDEN1 = 128
HIDDEN2 = 64
N_ACTIONS = 4
OUT_PAD = 128  # lane-dense output width (multiple of 128)


def dqn_kernel(x_ref, w1_ref, b1_ref, w2_ref, b2_ref, w3_ref, b3_ref, out_ref):
    # x_ref: (TB, n_states) bf16; weights bf16; biases f32; out_ref (TB, OUT_PAD) f32.
    # Layer 1: Linear(n_states, 128) + ReLU  (bf16 MXU, f32 accumulate)
    h1 = jnp.dot(x_ref[...], w1_ref[...], preferred_element_type=jnp.float32)
    h1 = jnp.maximum(h1 + b1_ref[...], 0.0).astype(jnp.bfloat16)

    # Layer 2: Linear(128, 64) + ReLU
    h2 = jnp.dot(h1, w2_ref[...], preferred_element_type=jnp.float32)
    h2 = jnp.maximum(h2 + b2_ref[...], 0.0).astype(jnp.bfloat16)

    # Layer 3: Linear(64, n_actions) -- W3 is padded to 128 lanes so the store
    # is an unmasked, lane-dense full vst.
    out = jnp.dot(h2, w3_ref[...], preferred_element_type=jnp.float32)
    out_ref[...] = (out + b3_ref[...]).astype(out_ref.dtype)


def dqn_forward(x, params, tb=256):
    """x: (batch, n_states) f32.  Returns (batch, n_actions) f32."""
    w1, b1, w2, b2, w3, b3 = params
    batch, n_states = x.shape
    n_actions = w3.shape[1]

    # --- lane-dense output: pad W3/b3 out to OUT_PAD lanes -------------------
    w3p = jnp.zeros((w3.shape[0], OUT_PAD), w3.dtype).at[:, :n_actions].set(w3)
    b3p = jnp.zeros((1, OUT_PAD), b3.dtype).at[:, :n_actions].set(b3)

    # --- bf16 activations/weights for the MXU (f32 accumulation in-kernel) ---
    x_bf = x.astype(jnp.bfloat16)
    w1_bf = w1.astype(jnp.bfloat16)
    w2_bf = w2.astype(jnp.bfloat16)
    w3_bf = w3p.astype(jnp.bfloat16)

    # --- batch tiling: TB multiple of 8, batch padded up to a multiple of TB -
    # NOTE: for per-env-step inference (batch <= ~32) a plain XLA dot chain is
    # just as fast -- this kernel pays off once the batch is large.
    tb = max(8, min(int(tb), 1024) // 8 * 8)
    if batch < tb:
        tb = max(8, ((batch + 7) // 8) * 8)
    padded = pl.cdiv(batch, tb) * tb
    if padded != batch:
        x_bf = jnp.pad(x_bf, ((0, padded - batch), (0, 0)))
    grid = (padded // tb,)

    # Weights/biases: full-array blocks with a constant index_map -> fetched
    # once, resident in VMEM across all grid steps.
    def resident(a):
        return pl.BlockSpec(a.shape, lambda i: (0,) * a.ndim)

    out = pl.pallas_call(
        dqn_kernel,
        out_shape=jax.ShapeDtypeStruct((padded, OUT_PAD), jnp.float32),
        grid=grid,
        in_specs=[
            pl.BlockSpec((tb, n_states), lambda i: (i, 0)),  # x: pipelined per tile
            resident(w1_bf), resident(b1),
            resident(w2_bf), resident(b2),
            resident(w3_bf), resident(b3p),
        ],
        out_specs=pl.BlockSpec((tb, OUT_PAD), lambda i: (i, 0)),
        compiler_params=pltpu.CompilerParams(
            dimension_semantics=("parallel",),  # v7x: shard batch over 2 TCs
        ),
    )(x_bf, w1_bf, b1, w2_bf, b2, w3_bf, b3p)

    return out[:batch, :n_actions]


def init_params(key, n_states=N_STATES, n_actions=N_ACTIONS):
    """Deterministic init mimicking nn.Linear's uniform(-1/sqrt(fan_in), ...)."""
    dims = [(n_states, HIDDEN1), (HIDDEN1, HIDDEN2), (HIDDEN2, n_actions)]
    params = []
    for fan_in, fan_out in dims:
        key, kw, kb = jax.random.split(key, 3)
        bound = 1.0 / jnp.sqrt(fan_in)
        w = jax.random.uniform(kw, (fan_in, fan_out), jnp.float32, -bound, bound)
        b = jax.random.uniform(kb, (1, fan_out), jnp.float32, -bound, bound)
        params += [w, b]
    return tuple(params)


def dqn_reference(x, params):
    """Reference with the same bf16-input / f32-accumulate math as the kernel."""
    w1, b1, w2, b2, w3, b3 = params
    xb = x.astype(jnp.bfloat16)
    h1 = jnp.dot(xb, w1.astype(jnp.bfloat16), preferred_element_type=jnp.float32) + b1
    h1 = jnp.maximum(h1, 0.0).astype(jnp.bfloat16)
    h2 = jnp.dot(h1, w2.astype(jnp.bfloat16), preferred_element_type=jnp.float32) + b2
    h2 = jnp.maximum(h2, 0.0).astype(jnp.bfloat16)
    return jnp.dot(h2, w3.astype(jnp.bfloat16), preferred_element_type=jnp.float32) + b3


def dqn_reference_f32(x, params):
    w1, b1, w2, b2, w3, b3 = params
    h1 = jnp.maximum(x @ w1 + b1, 0.0)
    h2 = jnp.maximum(h1 @ w2 + b2, 0.0)
    return h2 @ w3 + b3


if __name__ == "__main__":
    key = jax.random.PRNGKey(0)
    k_params, k_x = jax.random.split(key)

    n_states, n_actions, batch = N_STATES, N_ACTIONS, 512
    params = init_params(k_params, n_states, n_actions)
    x = jax.random.normal(k_x, (batch, n_states), jnp.float32)

    actions = dqn_forward(x, params, tb=256)
    jax.block_until_ready(actions)

    assert actions.shape == (batch, n_actions)
    # Tight check against a bf16-matched reference.
    ref_bf16 = dqn_reference(x, params)
    assert jnp.allclose(actions, ref_bf16, atol=1e-2, rtol=1e-2), float(
        jnp.max(jnp.abs(actions - ref_bf16))
    )
    # Loose sanity check against the full-f32 reference.
    ref_f32 = dqn_reference_f32(x, params)
    assert jnp.allclose(actions, ref_f32, atol=1e-1, rtol=1e-1), float(
        jnp.max(jnp.abs(actions - ref_f32))
    )

    print("KERNEL_OK")
</pallas_src>

<mosaic_0001>
module attributes {stable_mosaic.version = 11 : i64} {
  func.func @dqn_kernel(%arg0: i32, %arg1: memref<256x8xbf16, #tpu.memory_space<vmem>>, %arg2: memref<8x128xbf16, #tpu.memory_space<vmem>>, %arg3: memref<1x128xf32, #tpu.memory_space<vmem>>, %arg4: memref<128x64xbf16, #tpu.memory_space<vmem>>, %arg5: memref<1x64xf32, #tpu.memory_space<vmem>>, %arg6: memref<64x128xbf16, #tpu.memory_space<vmem>>, %arg7: memref<1x128xf32, #tpu.memory_space<vmem>>, %arg8: memref<256x128xf32, #tpu.memory_space<vmem>>) attributes {dimension_semantics = [#tpu.dimension_semantics<parallel>], iteration_bounds = array<i64: 2>, scalar_prefetch = 0 : i64, scratch_operands = 0 : i64, tpu.core_type = #tpu.core_type<tc>, window_params = [{transform_indices = @transform_0, window_bounds = array<i64: 256, 8>}, {pipeline_mode = #tpu.pipeline_mode<synchronous>, transform_indices = @transform_1, window_bounds = array<i64: 8, 128>}, {pipeline_mode = #tpu.pipeline_mode<synchronous>, transform_indices = @transform_2, window_bounds = array<i64: 1, 128>}, {pipeline_mode = #tpu.pipeline_mode<synchronous>, transform_indices = @transform_3, window_bounds = array<i64: 128, 64>}, {pipeline_mode = #tpu.pipeline_mode<synchronous>, transform_indices = @transform_4, window_bounds = array<i64: 1, 64>}, {pipeline_mode = #tpu.pipeline_mode<synchronous>, transform_indices = @transform_5, window_bounds = array<i64: 64, 128>}, {pipeline_mode = #tpu.pipeline_mode<synchronous>, transform_indices = @transform_6, window_bounds = array<i64: 1, 128>}, {transform_indices = @transform_7, window_bounds = array<i64: 256, 128>}]} {
    %c0 = arith.constant 0 : index
    %c0_0 = arith.constant 0 : index
    %0 = vector.load %arg1[%c0, %c0_0] : memref<256x8xbf16, #tpu.memory_space<vmem>>, vector<256x8xbf16>
    %c0_1 = arith.constant 0 : index
    %c0_2 = arith.constant 0 : index
    %1 = vector.load %arg2[%c0_1, %c0_2] : memref<8x128xbf16, #tpu.memory_space<vmem>>, vector<8x128xbf16>
    %cst = arith.constant dense<0.000000e+00> : vector<256x128xf32>
    %2 = tpu.matmul %0, %1, %cst {dimension_numbers = #tpu.dot_dimension_numbers<[1], [0], [0], [1], [0, 0, 1, 1], [], []>} : vector<256x8xbf16>, vector<8x128xbf16>, vector<256x128xf32> -> vector<256x128xf32>
    %c0_3 = arith.constant 0 : index
    %c0_4 = arith.constant 0 : index
    %3 = vector.load %arg3[%c0_3, %c0_4] : memref<1x128xf32, #tpu.memory_space<vmem>>, vector<1x128xf32>
    %4 = vector.broadcast %3 : vector<1x128xf32> to vector<256x128xf32>
    %5 = arith.addf %2, %4 : vector<256x128xf32>
    %cst_5 = arith.constant 0.000000e+00 : f32
    %6 = vector.broadcast %cst_5 : f32 to vector<256x128xf32>
    %7 = arith.maximumf %5, %6 : vector<256x128xf32>
    %8 = arith.truncf %7 : vector<256x128xf32> to vector<256x128xbf16>
    %c0_6 = arith.constant 0 : index
    %c0_7 = arith.constant 0 : index
    %9 = vector.load %arg4[%c0_6, %c0_7] : memref<128x64xbf16, #tpu.memory_space<vmem>>, vector<128x64xbf16>
    %cst_8 = arith.constant dense<0.000000e+00> : vector<256x64xf32>
    %10 = tpu.matmul %8, %9, %cst_8 {dimension_numbers = #tpu.dot_dimension_numbers<[1], [0], [0], [1], [0, 0, 1, 1], [], []>} : vector<256x128xbf16>, vector<128x64xbf16>, vector<256x64xf32> -> vector<256x64xf32>
    %c0_9 = arith.constant 0 : index
    %c0_10 = arith.constant 0 : index
    %11 = vector.load %arg5[%c0_9, %c0_10] : memref<1x64xf32, #tpu.memory_space<vmem>>, vector<1x64xf32>
    %12 = vector.broadcast %11 : vector<1x64xf32> to vector<256x64xf32>
    %13 = arith.addf %10, %12 : vector<256x64xf32>
    %cst_11 = arith.constant 0.000000e+00 : f32
    %14 = vector.broadcast %cst_11 : f32 to vector<256x64xf32>
    %15 = arith.maximumf %13, %14 : vector<256x64xf32>
    %16 = arith.truncf %15 : vector<256x64xf32> to vector<256x64xbf16>
    %c0_12 = arith.constant 0 : index
    %c0_13 = arith.constant 0 : index
    %17 = vector.load %arg6[%c0_12, %c0_13] : memref<64x128xbf16, #tpu.memory_space<vmem>>, vector<64x128xbf16>
    %cst_14 = arith.constant dense<0.000000e+00> : vector<256x128xf32>
    %18 = tpu.matmul %16, %17, %cst_14 {dimension_numbers = #tpu.dot_dimension_numbers<[1], [0], [0], [1], [0, 0, 1, 1], [], []>} : vector<256x64xbf16>, vector<64x128xbf16>, vector<256x128xf32> -> vector<256x128xf32>
    %c0_15 = arith.constant 0 : index
    %c0_16 = arith.constant 0 : index
    %19 = vector.load %arg7[%c0_15, %c0_16] : memref<1x128xf32, #tpu.memory_space<vmem>>, vector<1x128xf32>
    %20 = vector.broadcast %19 : vector<1x128xf32> to vector<256x128xf32>
    %21 = arith.addf %18, %20 : vector<256x128xf32>
    %c0_17 = arith.constant 0 : index
    %c0_18 = arith.constant 0 : index
    %22 = vector.load %arg8[%c0_17, %c0_18] : memref<256x128xf32, #tpu.memory_space<vmem>>, vector<256x128xf32>
    tpu.vector_store %arg8[%c0_17, %c0_18], %21 {strides = array<i32>} : memref<256x128xf32, #tpu.memory_space<vmem>>, vector<256x128xf32>,
    return
  }
  func.func @transform_0(%arg0: i32) -> (i32, i32) {
    %c0_i32 = arith.constant 0 : i32
    %c0_i32_0 = arith.constant 0 : i32
    return %arg0, %c0_i32 : i32, i32
  }
  func.func @transform_1(%arg0: i32) -> (i32, i32) {
    %c0_i32 = arith.constant 0 : i32
    %c0_i32_0 = arith.constant 0 : i32
    %c0_i32_1 = arith.constant 0 : i32
    return %c0_i32, %c0_i32_0 : i32, i32
  }
  func.func @transform_2(%arg0: i32) -> (i32, i32) {
    %c0_i32 = arith.constant 0 : i32
    %c0_i32_0 = arith.constant 0 : i32
    %c0_i32_1 = arith.constant 0 : i32
    return %c0_i32, %c0_i32_0 : i32, i32
  }
  func.func @transform_3(%arg0: i32) -> (i32, i32) {
    %c0_i32 = arith.constant 0 : i32
    %c0_i32_0 = arith.constant 0 : i32
    %c0_i32_1 = arith.constant 0 : i32
    return %c0_i32, %c0_i32_0 : i32, i32
  }
  func.func @transform_4(%arg0: i32) -> (i32, i32) {
    %c0_i32 = arith.constant 0 : i32
    %c0_i32_0 = arith.constant 0 : i32
    %c0_i32_1 = arith.constant 0 : i32
    return %c0_i32, %c0_i32_0 : i32, i32
  }
  func.func @transform_5(%arg0: i32) -> (i32, i32) {
    %c0_i32 = arith.constant 0 : i32
    %c0_i32_0 = arith.constant 0 : i32
    %c0_i32_1 = arith.constant 0 : i32
    return %c0_i32, %c0_i32_0 : i32, i32
  }
  func.func @transform_6(%arg0: i32) -> (i32, i32) {
    %c0_i32 = arith.constant 0 : i32
    %c0_i32_0 = arith.constant 0 : i32
    %c0_i32_1 = arith.constant 0 : i32
    return %c0_i32, %c0_i32_0 : i32, i32
  }
  func.func @transform_7(%arg0: i32) -> (i32, i32) {
    %c0_i32 = arith.constant 0 : i32
    %c0_i32_0 = arith.constant 0 : i32
    return %arg0, %c0_i32 : i32, i32
  }
}

</mosaic_0001>

<bundles_post_ra>
// kernel: tpu_custom_call.1
= control target key start
LH: loop header
LB: loop body
LE: loop exit
PB: predicated region body
PF: predicated region fallthrough
CT: control target
= control target key end

     0   :  { %12 = vsyncpa [#allocation3], 0  ;;  %s2086_s0 = inlined_call_operand.vmem [shape: bf16[512,8], index: 0, kind: input, shape index: {}]   ;;  %s2087_s1 = inlined_call_operand.vmem [shape: bf16[8,128], index: 1, kind: input, shape index: {}]   ;;  %s2088_s2 = inlined_call_operand.vmem [shape: f32[1,128], index: 2, kind: input, shape index: {}]   ;;  %s2089_s3 = inlined_call_operand.vmem [shape: bf16[128,64], index: 3, kind: input, shape index: {}]   ;;  %s2090_s4 = inlined_call_operand.vmem [shape: f32[1,64], index: 4, kind: input, shape index: {}]   ;;  %s2091_s5 = inlined_call_operand.vmem [shape: bf16[64,128], index: 5, kind: input, shape index: {}]   ;;  %s2092_s6 = inlined_call_operand.vmem [shape: f32[1,128], index: 6, kind: input, shape index: {}]   ;;  %s2093_s7 = inlined_call_operand.hbm [shape: f32[512,128], index: 7, kind: output, shape index: {}]  }
   0x1   :  { %14 = vsyncpa [#allocation3 + $0x1], 0  ;;  %s1739_s24 = smov 0   ;;  %s1741_s25 = smov 0  }
   0x2   :  { %s1743_s26 = smov 0   ;;  %s1745_s27 = smov 0  }
   0x3 LB: > { %s1760_s28 = sadd.s32 4294967295, %s1694_s27   ;;  %s1300_s29 = sadd.s32 4294967294, %s1694_s27   ;;  %s1694_s27 = sphi %s1745_s27, %s2099_s27   ;;  %s1690_s26 = sphi %s1743_s26, %s2098_s26   ;;  %s1686_s25 = sphi %s1741_s25, %s2097_s25   ;;  %s1682_s24 = sphi %s1739_s24, %s2096_s24  }
   0x4   : > { %s1764_s30 = sadd.s32 1, %s1694_s27   ;;  %s179_s8 = sadd.s32 1, %s1690_s26 }
   0x5   : > { %s176_s9 = ssub.s32 %s1694_s27, %s1764_s30  ;;  %p189_p0 = scmp.ne.s32.totalorder %s1690_s26, %s1686_s25 }
   0x6   : > { %p177_p1 = scmp.eq.s32.totalorder %s176_s9, 0  ;;  %p190_p2 = scmp.eq.s32.totalorder %s1760_s28, 1 }
   0x7   : > { %p195_p3 = scmp.ne.s32.totalorder %s1686_s25, %s1682_s24  ;;  %p196_p4 = scmp.eq.s32.totalorder %s1300_s29, 1 }
   0x8   : > { %s1775_s10 = scalar_select %p177_p1, %s1690_s26, %s179_s8  }
   0x9   : > { %p1777_p5 = por %p190_p2, %p189_p0  ;;  %p1781_p6 = por %p196_p4, %p195_p3 }
   0xa   : > { %p1303_p7 = scmp.ge.s32.totalorder %s1694_s27, 1  ;;  %p241_p8 = scmp.lt.s32.totalorder %s1694_s27, 3 }
   0xc   : > { %p242_p9 = pnand %p1303_p7, %p241_p8 }
   0xd   : > { %v313_v0 = vld [vmem:[%s2087_s1] sm:$0xf] (!%p242_p9)  ;;  %vm450_vm0 = vcmask (!%p242_p9), 1043456   ;;  %s1305_s15 = sshll.u32 (!%p242_p9), %s1760_s28, 5  ;;  %vm401_vm1 = vcmask (!%p242_p9), 64512   ;;  %v1621_v9 = vld [vmem:[%s2089_s3 + $0x8] sm:$0xff] (!%p242_p9)  }
   0xe   : > { %245 = sbr.rel (%p242_p9) target bundleno = 758 (0x2f6), region = 48  ;;  %v1620_v1 = vld [vmem:[%s2089_s3] sm:$0xff] (!%p242_p9)   ;;  %1561 = vmatprep.subr.msk.bf16.mxu0 (!%p242_p9), %vm450_vm0, %v313_v0  ;;  %v452_v2 = vsel (!%p242_p9), %vm450_vm0, %v313_v0, 0  ;;  %p274_p10 = scmp.lt.s32.totalorder (!%p242_p9), %s1305_s15, 63  ;;  %1562 = vmatprep.subr.msk.bf16.mxu1 (!%p242_p9), %vm450_vm0, %v313_v0  ;;  %v1622_v12 = vld [vmem:[%s2089_s3 + $0x10] sm:$0xff] (!%p242_p9)   ;;  %v1623_v17 = vld [vmem:[%s2089_s3 + $0x18] sm:$0xff] (!%p242_p9)  }
   0xf   : > { %1438 = vmatpush3.bf16.msra.mxu0 (!%p242_p9), %v452_v2  ;;  %1560 = vmatpush3.bf16.msra.mxu1 (!%p242_p9), %v452_v2  ;;  %v1624_v18 = vld [vmem:[%s2089_s3 + $0x20] sm:$0xff] (!%p242_p9)   ;;  %v1625_v22 = vld [vmem:[%s2089_s3 + $0x28] sm:$0xff] (!%p242_p9)   ;;  %v1626_v24 = vld [vmem:[%s2089_s3 + $0x30] sm:$0xff] (!%p242_p9)   ;;  %vm982_vm2 = vcmask (!%p242_p9), 523264   ;;  %s270_s20 = sand.u32 (!%p242_p9), 1, %s1686_s25   ;;  %s1375_s8 = sshll.u32 (!%p242_p9), %s1760_s28, 12 }
  0x10   : > { %1471 = vmatprep.subr.bf16.mxu1 (!%p242_p9), %v1620_v1  ;;  %v1627_v25 = vld [vmem:[%s2089_s3 + $0x38] sm:$0xff] (!%p242_p9)   ;;  %v1628_v26 = vld [vmem:[%s2091_s5] sm:$0xff] (!%p242_p9)   ;;  %v1629_v27 = vld [vmem:[%s2091_s5 + $0x8] sm:$0xff] (!%p242_p9)   ;;  %s1304_s22 = sshll.u32 (!%p242_p9), %s270_s20, 8  ;;  %s2045_s28 = scalar_lea.sflag (!%p242_p9), [#allocation3], %s270_s20 }
  0x11   : > { %1519 = vmatprep.subr.bf16.mxu0 (!%p242_p9), %v1628_v26  ;;  %v1630_v28 = vld [vmem:[%s2091_s5 + $0x10] sm:$0xff] (!%p242_p9)   ;;  %v1864_v29 = vld [vmem:[%s2088_s2] ss:$0 sm:$0xff] (!%p242_p9)  ;;  %s1696_s17 = smov (!%p242_p9), [#allocation2]  }
  0x15   : > { %s2101_s15 = smov (!%p274_p10, %s1305_s15), 63 }
  0x16   : > { %s1306_s18 = sshll.u32 %s2101_s15, 2  ;;  %s2035_s15 = scalar_lea.hbm %s2093_s7, %s1375_s8 }
  0x17   : > { %s1797_s21 = scalar_lea.vmem %s2086_s0, %s1306_s18  ;;  %s1636_s18 = sshll.u32 %s1696_s17, 4  ;;  %s1637_s18 = int_to_ptr.vmem [resolvable:$false] %s1636_s18 }
  0x18   : > { %v1604_v3 = vld [vmem:[%s1797_s21] sm:$0xff]   ;;  %v1605_v4 = vld [vmem:[%s1797_s21 + $0x8] sm:$0xff]   ;;  %v1606_v5 = vld [vmem:[%s1797_s21 + $0x10] sm:$0xff]   ;;  %s1638_s19 = scalar_lea.vmem %s1637_s18, 8192 }
  0x19   : > { %1439 = vmatprep.mubr.msk.bf16.mxu0 %vm401_vm1, %v1604_v3  ;;  %v1607_v6 = vld [vmem:[%s1797_s21 + $0x18] sm:$0xff]   ;;  %v1608_v7 = vld [vmem:[%s1797_s21 + $0x20] sm:$0xff]   ;;  %v1613_v10 = vld [vmem:[%s1797_s21 + $0x48] sm:$0xff]  }
  0x1a   : > { %1440 = vmatmul.mubr.msk.bf16.vlgmr.msra.gmra.mrb[0].mxu0 %vm401_vm1, %v1605_v4  ;;  %v1612_v8 = vld [vmem:[%s1797_s21 + $0x40] sm:$0xff]   ;;  %v1614_v11 = vld [vmem:[%s1797_s21 + $0x50] sm:$0xff]   ;;  %v1609_v13 = vld [vmem:[%s1797_s21 + $0x28] sm:$0xff]  }
  0x1b   : > { %1443 = vmatprep.mubr.msk.bf16.mxu0 %vm401_vm1, %v1606_v5  ;;  %1455 = vmatprep.mubr.msk.bf16.mxu1 %vm401_vm1, %v1612_v8  ;;  %v1610_v14 = vld [vmem:[%s1797_s21 + $0x30] sm:$0xff]   ;;  %v1615_v15 = vld [vmem:[%s1797_s21 + $0x58] sm:$0xff]   ;;  %v1616_v16 = vld [vmem:[%s1797_s21 + $0x60] sm:$0xff]  }
  0x1c   : > { %1456 = vmatmul.mubr.msk.bf16.vlgmr.msra.gmra.mrb[0].mxu1 %vm401_vm1, %v1613_v10  ;;  %v1611_v19 = vld [vmem:[%s1797_s21 + $0x38] sm:$0xff]   ;;  %v1617_v20 = vld [vmem:[%s1797_s21 + $0x68] sm:$0xff]   ;;  %v1618_v21 = vld [vmem:[%s1797_s21 + $0x70] sm:$0xff]   ;;  %1520 = vmatpush3.bf16.msra.mxu0 %v1628_v26 }
  0x1d   : > { %1459 = vmatprep.mubr.msk.bf16.mxu1 %vm401_vm1, %v1614_v11  ;;  %1472 = vmatpush3.bf16.msra.mxu1 %v1620_v1  ;;  %v1619_v23 = vld [vmem:[%s1797_s21 + $0x78] sm:$0xff]   ;;  %s1970_s21 = scalar_lea.vmem [#allocation2], %s1304_s22 }
  0x1e   : > { %1473 = vmatprep.subr.bf16.mxu1 %v1621_v9  ;;  %1521 = vmatprep.subr.bf16.mxu0 %v1629_v27  ;;  %s1238_s9 = sshll.u32 %s1970_s21, 4  ;;  %s2037_s9 = int_to_ptr.vmem [resolvable:$true] %s1238_s9 }
  0x1f   : > { %s1632_s16 = scalar_lea.vmem %s2037_s9, 4096  ;;  %p1639_p0 = scmp.lt.s32.totalorder %s2037_s9, %s1637_s18 }
  0x20   : > { %1522 = vmatpush3.bf16.msra.mxu0 %v1629_v27  ;;  %p1633_p11 = scmp.ne.s32.totalorder %s2037_s9, %s1632_s16  ;;  %p1640_p1 = scmp.lt.s32.totalorder %s1638_s19, %s1632_s16 }
  0x21   : > { %1474 = vmatpush3.bf16.msra.mxu1 %v1621_v9  ;;  %1523 = vmatprep.subr.bf16.mxu0 %v1630_v28 }
  0x22   : > { %1444 = vmatmul.mubr.msk.bf16.gmra.mrb[4].mxu0 %vm401_vm1, %v1607_v6  ;;  %1475 = vmatprep.subr.bf16.mxu1 %v1622_v12  ;;  %p1634_p12 = pnand %p1633_p11, %p1777_p5  ;;  %p1641_p2 = por %p1640_p1, %p1639_p0 }
  0x23   : > { %1447 = vmatprep.mubr.msk.bf16.mxu0 %vm401_vm1, %v1608_v7 }
  0x24   : > { %1460 = vmatmul.mubr.msk.bf16.gmra.mrb[4].mxu1 %vm401_vm1, %v1615_v15  ;;  %1524 = vmatpush3.bf16.msra.mxu0 %v1630_v28  ;;  %p1635_p13 = pneg %p1634_p12 }
  0x25   : > { %1463 = vmatprep.mubr.msk.bf16.mxu1 %vm401_vm1, %v1616_v16  ;;  %1476 = vmatpush3.bf16.msra.mxu1 %v1622_v12 }
  0x26   : > { %1477 = vmatprep.subr.bf16.mxu1 %v1623_v17  ;;  %p1642_p3 = pnand %p1641_p2, %p1635_p13 }
  0x29   : > { %1478 = vmatpush3.bf16.msra.mxu1 %v1623_v17 }
  0x2a   : > { %1448 = vmatmul.mubr.msk.bf16.gmra.mrb[8].mxu0 %vm401_vm1, %v1609_v13  ;;  %1479 = vmatprep.subr.bf16.mxu1 %v1624_v18 }
  0x2b   : > { %1451 = vmatprep.mubr.msk.bf16.mxu0 %vm401_vm1, %v1610_v14 }
  0x2c   : > { %1464 = vmatmul.mubr.msk.bf16.gmra.mrb[8].mxu1 %vm401_vm1, %v1617_v20 }
  0x2d   : > { %1467 = vmatprep.mubr.msk.bf16.mxu1 %vm401_vm1, %v1618_v21  ;;  %1480 = vmatpush3.bf16.msra.mxu1 %v1624_v18 }
  0x2e   : > { %1481 = vmatprep.subr.bf16.mxu1 %v1625_v22 }
  0x31   : > { %1482 = vmatpush3.bf16.msra.mxu1 %v1625_v22 }
  0x32   : > { %1452 = vmatmul.mubr.msk.bf16.gmra.mrb[12].mxu0 %vm401_vm1, %v1611_v19  ;;  %1483 = vmatprep.subr.bf16.mxu1 %v1626_v24 }
  0x34   : > { %1468 = vmatmul.mubr.msk.bf16.gmra.mrb[12].mxu1 %vm401_vm1, %v1619_v23 }
  0x35   : > { %1484 = vmatpush3.bf16.msra.mxu1 %v1626_v24 }
  0x36   : > { %1485 = vmatprep.subr.bf16.mxu1 %v1627_v25 }
  0x39   : > { %1486 = vmatpush3.bf16.msra.mxu1 %v1627_v25 }
  0xed   : > { %v1441_v30 = vpop.f32.mrb[0].mxu0 }
  0xee   : > { %v497_v31 = vadd.f32 %v1441_v30, %v1864_v29  ;;  %v488_v32 = vpop.f32.mrb[1].mxu0 }
  0xef   : > { %v489_v33 = vadd.f32 %v1864_v29, %v488_v32  ;;  %v1442_v34 = vpop.f32.mrb[2].mxu0  ;;  %v1457_v45 = vpop.f32.mrb[0].mxu1 }
  0xf0   : > { %v500_v35 = vadd.f32 %v1442_v34, %v1864_v29  ;;  %v491_v36 = vpop.f32.mrb[3].mxu0  ;;  %v617_v38 = vmax.f32 %v497_v31, 0.0  ;;  %v561_v48 = vadd.f32 %v1457_v45, %v1864_v29  ;;  %v552_v49 = vpop.f32.mrb[1].mxu1 }
  0xf1   : > { %v492_v37 = vadd.f32 %v1864_v29, %v491_v36  ;;  %v615_v40 = vmax.f32 %v489_v33, 0.0  ;;  %v553_v52 = vadd.f32 %v1864_v29, %v552_v49  ;;  %v1458_v53 = vpop.f32.mrb[2].mxu1 }
  0xf2   : > { %v618_v39 = vmax.f32 %v500_v35, 0.0  ;;  %v633_v56 = vmax.f32 %v561_v48, 0.0  ;;  %v564_v57 = vadd.f32 %v1458_v53, %v1864_v29  ;;  %v555_v58 = vpop.f32.mrb[3].mxu1 }
  0xf3   : > { %v616_v41 = vmax.f32 %v492_v37, 0.0  ;;  %v631_v60 = vmax.f32 %v553_v52, 0.0  ;;  %v556_v61 = vadd.f32 %v1864_v29, %v555_v58 }
  0xf4   : > { %v648_v42 = vpack.c.bf16 %v618_v39, %v617_v38  ;;  %v634_v0 = vmax.f32 %v564_v57, 0.0 }
  0xf5   : > { %v647_v43 = vpack.c.bf16 %v616_v41, %v615_v40  ;;  %v1445_v44 = vpop.f32.mrb[4].mxu0  ;;  %v632_v3 = vmax.f32 %v556_v61, 0.0 }
  0xf6   : > { %v513_v46 = vadd.f32 %v1445_v44, %v1864_v29  ;;  %v504_v47 = vpop.f32.mrb[5].mxu0  ;;  %v1878_v5 = vpack.c.bf16 %v634_v0, %v633_v56 }
  0xf7   : > { %v505_v50 = vadd.f32 %v1864_v29, %v504_v47  ;;  %v1446_v51 = vpop.f32.mrb[6].mxu0  ;;  %1487 = vmatprep.mubr.bf16.mxu1 %v647_v43  ;;  %v1880_v8 = vpack.c.bf16 %v632_v3, %v631_v60  ;;  %v1461_v9 = vpop.f32.mrb[4].mxu1 }
  0xf8   : > { %v516_v54 = vadd.f32 %v1446_v51, %v1864_v29  ;;  %v507_v55 = vpop.f32.mrb[7].mxu0  ;;  %1488 = vmatmul.mubr.bf16.vlgmr.msra.gmra.mrb[16].mxu1 %v648_v42  ;;  %v621_v62 = vmax.f32 %v513_v46, 0.0  ;;  %v577_v12 = vadd.f32 %v1461_v9, %v1864_v29  ;;  %v568_v13 = vpop.f32.mrb[5].mxu1 }
  0xf9   : > { %v508_v59 = vadd.f32 %v1864_v29, %v507_v55  ;;  %v619_v1 = vmax.f32 %v505_v50, 0.0  ;;  %v569_v16 = vadd.f32 %v1864_v29, %v568_v13  ;;  %v1462_v17 = vpop.f32.mrb[6].mxu1 }
  0xfa   : > { %v622_v63 = vmax.f32 %v516_v54, 0.0  ;;  %v637_v20 = vmax.f32 %v577_v12, 0.0  ;;  %v580_v21 = vadd.f32 %v1462_v17, %v1864_v29  ;;  %v571_v22 = vpop.f32.mrb[7].mxu1  ;;  %v1631_v17 = vld [vmem:[%s2091_s5 + $0x18] sm:$0xff]  }
  0xfb   : > { %v620_v2 = vmax.f32 %v508_v59, 0.0  ;;  %v635_v24 = vmax.f32 %v569_v16, 0.0  ;;  %v572_v25 = vadd.f32 %v1864_v29, %v571_v22  ;;  %1525 = vmatprep.subr.bf16.mxu0 %v1631_v17 }
  0xfc   : > { %v650_v4 = vpack.c.bf16 %v622_v63, %v621_v62  ;;  %v638_v28 = vmax.f32 %v580_v21, 0.0  ;;  %1526 = vmatpush3.bf16.msra.mxu0 %v1631_v17 }
  0xfd   : > { %v649_v6 = vpack.c.bf16 %v620_v2, %v619_v1  ;;  %v1449_v7 = vpop.f32.mrb[8].mxu0  ;;  %v636_v32 = vmax.f32 %v572_v25, 0.0 }
  0xfe   : > { %v529_v10 = vadd.f32 %v1449_v7, %v1864_v29  ;;  %v520_v11 = vpop.f32.mrb[9].mxu0  ;;  %v658_v34 = vpack.c.bf16 %v638_v28, %v637_v20 }
  0xff   : > { %v521_v14 = vadd.f32 %v1864_v29, %v520_v11  ;;  %v1450_v15 = vpop.f32.mrb[10].mxu0  ;;  %1491 = vmatprep.mubr.bf16.mxu1 %v649_v6  ;;  %v657_v37 = vpack.c.bf16 %v636_v32, %v635_v24  ;;  %v1465_v38 = vpop.f32.mrb[8].mxu1 }
 0x100   : > { %v532_v18 = vadd.f32 %v1450_v15, %v1864_v29  ;;  %v523_v19 = vpop.f32.mrb[11].mxu0  ;;  %1492 = vmatmul.mubr.bf16.gmra.mrb[20].mxu1 %v650_v4  ;;  %v625_v26 = vmax.f32 %v529_v10, 0.0  ;;  %v593_v41 = vadd.f32 %v1465_v38, %v1864_v29  ;;  %v584_v42 = vpop.f32.mrb[9].mxu1 }
 0x101   : > { %v524_v23 = vadd.f32 %v1864_v29, %v523_v19  ;;  %v623_v30 = vmax.f32 %v521_v14, 0.0  ;;  %v585_v45 = vadd.f32 %v1864_v29, %v584_v42  ;;  %v1466_v46 = vpop.f32.mrb[10].mxu1 }
 0x102   : > { %v626_v27 = vmax.f32 %v532_v18, 0.0  ;;  %v641_v49 = vmax.f32 %v593_v41, 0.0  ;;  %v596_v50 = vadd.f32 %v1466_v46, %v1864_v29  ;;  %v587_v51 = vpop.f32.mrb[11].mxu1 }
 0x103   : > { %v624_v31 = vmax.f32 %v524_v23, 0.0  ;;  %v639_v53 = vmax.f32 %v585_v45, 0.0  ;;  %v588_v54 = vadd.f32 %v1864_v29, %v587_v51 }
 0x104   : > { %v652_v33 = vpack.c.bf16 %v626_v27, %v625_v26  ;;  %v642_v57 = vmax.f32 %v596_v50, 0.0 }
 0x105   : > { %v651_v35 = vpack.c.bf16 %v624_v31, %v623_v30  ;;  %v1453_v36 = vpop.f32.mrb[12].mxu0  ;;  %v640_v60 = vmax.f32 %v588_v54, 0.0 }
 0x106   : > { %v545_v39 = vadd.f32 %v1453_v36, %v1864_v29  ;;  %v536_v40 = vpop.f32.mrb[13].mxu0  ;;  %v660_v62 = vpack.c.bf16 %v642_v57, %v641_v49 }
 0x107   : > { %v537_v43 = vadd.f32 %v1864_v29, %v536_v40  ;;  %v1454_v44 = vpop.f32.mrb[14].mxu0  ;;  %1495 = vmatprep.mubr.bf16.mxu1 %v651_v35  ;;  %v659_v0 = vpack.c.bf16 %v640_v60, %v639_v53  ;;  %v1469_v1 = vpop.f32.mrb[12].mxu1 }
 0x108   : > { %v548_v47 = vadd.f32 %v1454_v44, %v1864_v29  ;;  %v539_v48 = vpop.f32.mrb[15].mxu0  ;;  %1496 = vmatmul.mubr.bf16.gmra.mrb[24].mxu1 %v652_v33  ;;  %v629_v55 = vmax.f32 %v545_v39, 0.0  ;;  %v609_v2 = vadd.f32 %v1469_v1, %v1864_v29  ;;  %v600_v3 = vpop.f32.mrb[13].mxu1 }
 0x109   : > { %v540_v52 = vadd.f32 %v1864_v29, %v539_v48  ;;  %v627_v58 = vmax.f32 %v537_v43, 0.0  ;;  %v601_v4 = vadd.f32 %v1864_v29, %v600_v3  ;;  %v1470_v6 = vpop.f32.mrb[14].mxu1 }
 0x10a   : > { %v630_v56 = vmax.f32 %v548_v47, 0.0  ;;  %v645_v7 = vmax.f32 %v609_v2, 0.0  ;;  %v612_v9 = vadd.f32 %v1470_v6, %v1864_v29  ;;  %v603_v10 = vpop.f32.mrb[15].mxu1 }
 0x10b   : > { %v628_v59 = vmax.f32 %v540_v52, 0.0  ;;  %v643_v11 = vmax.f32 %v601_v4, 0.0  ;;  %v604_v12 = vadd.f32 %v1864_v29, %v603_v10  ;;  %v1910_v29 = vld [vmem:[%s2090_s4] ss:$0 sm:$0xff] }
 0x10c   : > { %v654_v61 = vpack.c.bf16 %v630_v56, %v629_v55  ;;  %v646_v13 = vmax.f32 %v612_v9, 0.0 }
 0x10d   : > { %v653_v63 = vpack.c.bf16 %v628_v59, %v627_v58  ;;  %v644_v14 = vmax.f32 %v604_v12, 0.0 }
 0x10e   : > { %v662_v15 = vpack.c.bf16 %v646_v13, %v645_v7 }
 0x10f   : > { %1499 = vmatprep.mubr.bf16.mxu1 %v653_v63  ;;  %v661_v16 = vpack.c.bf16 %v644_v14, %v643_v11 }
 0x110   : > { %1500 = vmatmul.mubr.bf16.gmra.mrb[28].mxu1 %v654_v61 }
 0x111   : > { %1503 = vmatprep.mubr.bf16.mxu1 %v1880_v8 }
 0x118   : > { %1504 = vmatmul.mubr.bf16.gmra.mrb[32].mxu1 %v1878_v5 }
 0x119   : > { %1507 = vmatprep.mubr.bf16.mxu1 %v657_v37 }
 0x120   : > { %1508 = vmatmul.mubr.bf16.gmra.mrb[36].mxu1 %v658_v34 }
 0x121   : > { %1511 = vmatprep.mubr.bf16.mxu1 %v659_v0 }
 0x128   : > { %1512 = vmatmul.mubr.bf16.gmra.mrb[40].mxu1 %v660_v62 }
 0x129   : > { %1515 = vmatprep.mubr.bf16.mxu1 %v661_v16 }
 0x130   : > { %1516 = vmatmul.mubr.bf16.gmra.mrb[44].mxu1 %v662_v15 }
 0x1cb   : > { %v1489_v8 = vpop.f32.mrb[16].mxu1 }
 0x1cc   : > { %v777_v5 = vadd.f32 %v1489_v8, %v1910_v29  ;;  %v768_v18 = vpop.f32.mrb[17].mxu1 }
 0x1cd   : > { %v769_v19 = vadd.f32 %v1910_v29, %v768_v18  ;;  %v1490_v20 = vpop.f32.mrb[18].mxu1 }
 0x1ce   : > { %v780_v21 = vadd.f32 %v1490_v20, %v1910_v29  ;;  %v771_v22 = vpop.f32.mrb[19].mxu1  ;;  %v897_v24 = vmax.f32 %v777_v5, 0.0 }
 0x1cf   : > { %v772_v23 = vadd.f32 %v1910_v29, %v771_v22  ;;  %v895_v26 = vmax.f32 %v769_v19, 0.0 }
 0x1d0   : > { %v898_v25 = vmax.f32 %v780_v21, 0.0 }
 0x1d1   : > { %v896_v27 = vmax.f32 %v772_v23, 0.0 }
 0x1d2   : > { %v928_v28 = vpack.c.bf16 %v898_v25, %v897_v24 }
 0x1d3   : > { %v927_v30 = vpack.c.bf16 %v896_v27, %v895_v26  ;;  %v1493_v31 = vpop.f32.mrb[20].mxu1 }
 0x1d4   : > { %v793_v32 = vadd.f32 %v1493_v31, %v1910_v29  ;;  %v784_v33 = vpop.f32.mrb[21].mxu1 }
 0x1d5   : > { %v785_v34 = vadd.f32 %v1910_v29, %v784_v33  ;;  %v1494_v35 = vpop.f32.mrb[22].mxu1  ;;  %1527 = vmatprep.mubr.msk.bf16.mxu0 %vm982_vm2, %v927_v30 }
 0x1d6   : > { %v796_v36 = vadd.f32 %v1494_v35, %v1910_v29  ;;  %v787_v37 = vpop.f32.mrb[23].mxu1  ;;  %1528 = vmatmul.mubr.msk.bf16.vlgmr.msra.gmra.mrb[16].mxu0 %vm982_vm2, %v928_v28  ;;  %v901_v39 = vmax.f32 %v793_v32, 0.0 }
 0x1d7   : > { %v788_v38 = vadd.f32 %v1910_v29, %v787_v37  ;;  %v899_v41 = vmax.f32 %v785_v34, 0.0 }
 0x1d8   : > { %v902_v40 = vmax.f32 %v796_v36, 0.0 }
 0x1d9   : > { %v900_v42 = vmax.f32 %v788_v38, 0.0 }
 0x1da   : > { %v930_v43 = vpack.c.bf16 %v902_v40, %v901_v39 }
 0x1db   : > { %v929_v44 = vpack.c.bf16 %v900_v42, %v899_v41  ;;  %v1497_v45 = vpop.f32.mrb[24].mxu1 }
 0x1dc   : > { %v809_v46 = vadd.f32 %v1497_v45, %v1910_v29  ;;  %v800_v47 = vpop.f32.mrb[25].mxu1 }
 0x1dd   : > { %v801_v48 = vadd.f32 %v1910_v29, %v800_v47  ;;  %v1498_v49 = vpop.f32.mrb[26].mxu1  ;;  %1531 = vmatprep.mubr.msk.bf16.mxu0 %vm982_vm2, %v929_v44 }
 0x1de   : > { %v812_v50 = vadd.f32 %v1498_v49, %v1910_v29  ;;  %v803_v51 = vpop.f32.mrb[27].mxu1  ;;  %1532 = vmatmul.mubr.msk.bf16.gmra.mrb[20].mxu0 %vm982_vm2, %v930_v43  ;;  %v905_v53 = vmax.f32 %v809_v46, 0.0 }
 0x1df   : > { %v804_v52 = vadd.f32 %v1910_v29, %v803_v51  ;;  %v903_v55 = vmax.f32 %v801_v48, 0.0 }
 0x1e0   : > { %v906_v54 = vmax.f32 %v812_v50, 0.0 }
 0x1e1   : > { %v904_v56 = vmax.f32 %v804_v52, 0.0 }
 0x1e2   : > { %v932_v57 = vpack.c.bf16 %v906_v54, %v905_v53 }
 0x1e3   : > { %v931_v58 = vpack.c.bf16 %v904_v56, %v903_v55  ;;  %v1501_v59 = vpop.f32.mrb[28].mxu1 }
 0x1e4   : > { %v825_v60 = vadd.f32 %v1501_v59, %v1910_v29  ;;  %v816_v61 = vpop.f32.mrb[29].mxu1 }
 0x1e5   : > { %v817_v62 = vadd.f32 %v1910_v29, %v816_v61  ;;  %v1502_v63 = vpop.f32.mrb[30].mxu1  ;;  %1535 = vmatprep.mubr.msk.bf16.mxu0 %vm982_vm2, %v931_v58 }
 0x1e6   : > { %v828_v0 = vadd.f32 %v1502_v63, %v1910_v29  ;;  %v819_v1 = vpop.f32.mrb[31].mxu1  ;;  %1536 = vmatmul.mubr.msk.bf16.gmra.mrb[24].mxu0 %vm982_vm2, %v932_v57  ;;  %v909_v3 = vmax.f32 %v825_v60, 0.0 }
 0x1e7   : > { %v820_v2 = vadd.f32 %v1910_v29, %v819_v1  ;;  %v907_v6 = vmax.f32 %v817_v62, 0.0 }
 0x1e8   : > { %v910_v4 = vmax.f32 %v828_v0, 0.0 }
 0x1e9   : > { %v908_v7 = vmax.f32 %v820_v2, 0.0  ;;  %v1966_v2 = vld [vmem:[%s2092_s6] ss:$0 sm:$0xff] }
 0x1ea   : > { %v934_v9 = vpack.c.bf16 %v910_v4, %v909_v3 }
 0x1eb   : > { %v933_v10 = vpack.c.bf16 %v908_v7, %v907_v6  ;;  %v1505_v11 = vpop.f32.mrb[32].mxu1 }
 0x1ec   : > { %v841_v12 = vadd.f32 %v1505_v11, %v1910_v29  ;;  %v832_v13 = vpop.f32.mrb[33].mxu1 }
 0x1ed   : > { %v833_v14 = vadd.f32 %v1910_v29, %v832_v13  ;;  %v1506_v15 = vpop.f32.mrb[34].mxu1  ;;  %1539 = vmatprep.mubr.msk.bf16.mxu0 %vm982_vm2, %v933_v10 }
 0x1ee   : > { %v844_v16 = vadd.f32 %v1506_v15, %v1910_v29  ;;  %v835_v17 = vpop.f32.mrb[35].mxu1  ;;  %1540 = vmatmul.mubr.msk.bf16.gmra.mrb[28].mxu0 %vm982_vm2, %v934_v9  ;;  %v913_v5 = vmax.f32 %v841_v12, 0.0 }
 0x1ef   : > { %v836_v8 = vadd.f32 %v1910_v29, %v835_v17  ;;  %v911_v19 = vmax.f32 %v833_v14, 0.0 }
 0x1f0   : > { %v914_v18 = vmax.f32 %v844_v16, 0.0 }
 0x1f1   : > { %v912_v20 = vmax.f32 %v836_v8, 0.0 }
 0x1f2   : > { %v936_v21 = vpack.c.bf16 %v914_v18, %v913_v5 }
 0x1f3   : > { %v935_v22 = vpack.c.bf16 %v912_v20, %v911_v19  ;;  %v1509_v23 = vpop.f32.mrb[36].mxu1 }
 0x1f4   : > { %v857_v24 = vadd.f32 %v1509_v23, %v1910_v29  ;;  %v848_v25 = vpop.f32.mrb[37].mxu1 }
 0x1f5   : > { %v849_v26 = vadd.f32 %v1910_v29, %v848_v25  ;;  %v1510_v27 = vpop.f32.mrb[38].mxu1  ;;  %1543 = vmatprep.mubr.msk.bf16.mxu0 %vm982_vm2, %v935_v22 }
 0x1f6   : > { %v860_v28 = vadd.f32 %v1510_v27, %v1910_v29  ;;  %v851_v30 = vpop.f32.mrb[39].mxu1  ;;  %1544 = vmatmul.mubr.msk.bf16.gmra.mrb[32].mxu0 %vm982_vm2, %v936_v21  ;;  %v917_v32 = vmax.f32 %v857_v24, 0.0 }
 0x1f7   : > { %v852_v31 = vadd.f32 %v1910_v29, %v851_v30  ;;  %v915_v34 = vmax.f32 %v849_v26, 0.0 }
 0x1f8   : > { %v918_v33 = vmax.f32 %v860_v28, 0.0 }
 0x1f9   : > { %v916_v35 = vmax.f32 %v852_v31, 0.0 }
 0x1fa   : > { %v938_v36 = vpack.c.bf16 %v918_v33, %v917_v32 }
 0x1fb   : > { %v937_v37 = vpack.c.bf16 %v916_v35, %v915_v34  ;;  %v1513_v38 = vpop.f32.mrb[40].mxu1 }
 0x1fc   : > { %v873_v39 = vadd.f32 %v1513_v38, %v1910_v29  ;;  %v864_v40 = vpop.f32.mrb[41].mxu1 }
 0x1fd   : > { %v865_v41 = vadd.f32 %v1910_v29, %v864_v40  ;;  %v1514_v42 = vpop.f32.mrb[42].mxu1  ;;  %1547 = vmatprep.mubr.msk.bf16.mxu0 %vm982_vm2, %v937_v37 }
 0x1fe   : > { %v876_v43 = vadd.f32 %v1514_v42, %v1910_v29  ;;  %v867_v44 = vpop.f32.mrb[43].mxu1  ;;  %1548 = vmatmul.mubr.msk.bf16.gmra.mrb[36].mxu0 %vm982_vm2, %v938_v36  ;;  %v921_v46 = vmax.f32 %v873_v39, 0.0 }
 0x1ff   : > { %v868_v45 = vadd.f32 %v1910_v29, %v867_v44  ;;  %v919_v48 = vmax.f32 %v865_v41, 0.0 }
 0x200   : > { %v922_v47 = vmax.f32 %v876_v43, 0.0 }
 0x201   : > { %v920_v49 = vmax.f32 %v868_v45, 0.0 }
 0x202   : > { %v940_v50 = vpack.c.bf16 %v922_v47, %v921_v46 }
 0x203   : > { %v939_v51 = vpack.c.bf16 %v920_v49, %v919_v48  ;;  %v1517_v52 = vpop.f32.mrb[44].mxu1 }
 0x204   : > { %v889_v53 = vadd.f32 %v1517_v52, %v1910_v29  ;;  %v880_v54 = vpop.f32.mrb[45].mxu1 }
 0x205   : > { %v881_v55 = vadd.f32 %v1910_v29, %v880_v54  ;;  %v1518_v56 = vpop.f32.mrb[46].mxu1  ;;  %1551 = vmatprep.mubr.msk.bf16.mxu0 %vm982_vm2, %v939_v51 }
 0x206   : > { %v892_v57 = vadd.f32 %v1518_v56, %v1910_v29  ;;  %v883_v58 = vpop.f32.mrb[47].mxu1  ;;  %1552 = vmatmul.mubr.msk.bf16.gmra.mrb[40].mxu0 %vm982_vm2, %v940_v50  ;;  %v925_v60 = vmax.f32 %v889_v53, 0.0 }
 0x207   : > { %v884_v59 = vadd.f32 %v1910_v29, %v883_v58  ;;  %v923_v62 = vmax.f32 %v881_v55, 0.0 }
 0x208   : > { %v926_v61 = vmax.f32 %v892_v57, 0.0 }
 0x209   : > { %v924_v63 = vmax.f32 %v884_v59, 0.0 }
 0x20a   : > { %v942_v0 = vpack.c.bf16 %v926_v61, %v925_v60 }
 0x20b   : > { %v941_v1 = vpack.c.bf16 %v924_v63, %v923_v62 }
 0x20d   : > { %1555 = vmatprep.mubr.msk.bf16.mxu0 %vm982_vm2, %v941_v1 }
 0x20e   : > { %1556 = vmatmul.mubr.msk.bf16.gmra.mrb[44].mxu0 %vm982_vm2, %v942_v0 }
 0x2a9   : > { %v1529_v3 = vpop.f32.mrb[16].mxu0 }
 0x2aa   : > { %v1074_v29 = vadd.f32 %v1529_v3, %v1966_v2  ;;  %v1065_v4 = vpop.f32.mrb[17].mxu0 }
 0x2ab   : > { %v1066_v6 = vadd.f32 %v1966_v2, %v1065_v4  ;;  %v1530_v7 = vpop.f32.mrb[18].mxu0 }
 0x2ac   : > { %1194 = vst [vmem:[%s1970_s21 + $0x10] sm:$0xff] %v1074_v29  ;;  %v1077_v9 = vadd.f32 %v1530_v7, %v1966_v2  ;;  %v1068_v10 = vpop.f32.mrb[19].mxu0 }
 0x2ad   : > { %1192 = vst [vmem:[%s1970_s21] sm:$0xff] %v1066_v6  ;;  %v1069_v11 = vadd.f32 %v1966_v2, %v1068_v10 }
 0x2ae   : > { %1195 = vst [vmem:[%s1970_s21 + $0x18] sm:$0xff] %v1077_v9 }
 0x2af   : > { %1193 = vst [vmem:[%s1970_s21 + $0x8] sm:$0xff] %v1069_v11 }
 0x2b1   : > { %v1533_v12 = vpop.f32.mrb[20].mxu0 }
 0x2b2   : > { %v1090_v13 = vadd.f32 %v1533_v12, %v1966_v2  ;;  %v1081_v14 = vpop.f32.mrb[21].mxu0 }
 0x2b3   : > { %v1082_v15 = vadd.f32 %v1966_v2, %v1081_v14  ;;  %v1534_v16 = vpop.f32.mrb[22].mxu0 }
 0x2b4   : > { %1198 = vst [vmem:[%s1970_s21 + $0x30] sm:$0xff] %v1090_v13  ;;  %v1093_v17 = vadd.f32 %v1534_v16, %v1966_v2  ;;  %v1084_v8 = vpop.f32.mrb[23].mxu0 }
 0x2b5   : > { %1196 = vst [vmem:[%s1970_s21 + $0x20] sm:$0xff] %v1082_v15  ;;  %v1085_v5 = vadd.f32 %v1966_v2, %v1084_v8 }
 0x2b6   : > { %1199 = vst [vmem:[%s1970_s21 + $0x38] sm:$0xff] %v1093_v17 }
 0x2b7   : > { %1197 = vst [vmem:[%s1970_s21 + $0x28] sm:$0xff] %v1085_v5 }
 0x2b9   : > { %v1537_v18 = vpop.f32.mrb[24].mxu0 }
 0x2ba   : > { %v1106_v19 = vadd.f32 %v1537_v18, %v1966_v2  ;;  %v1097_v20 = vpop.f32.mrb[25].mxu0 }
 0x2bb   : > { %v1098_v21 = vadd.f32 %v1966_v2, %v1097_v20  ;;  %v1538_v22 = vpop.f32.mrb[26].mxu0 }
 0x2bc   : > { %1202 = vst [vmem:[%s1970_s21 + $0x50] sm:$0xff] %v1106_v19  ;;  %v1109_v23 = vadd.f32 %v1538_v22, %v1966_v2  ;;  %v1100_v24 = vpop.f32.mrb[27].mxu0 }
 0x2bd   : > { %1200 = vst [vmem:[%s1970_s21 + $0x40] sm:$0xff] %v1098_v21  ;;  %v1101_v25 = vadd.f32 %v1966_v2, %v1100_v24 }
 0x2be   : > { %1203 = vst [vmem:[%s1970_s21 + $0x58] sm:$0xff] %v1109_v23 }
 0x2bf   : > { %1201 = vst [vmem:[%s1970_s21 + $0x48] sm:$0xff] %v1101_v25 }
 0x2c1   : > { %v1541_v26 = vpop.f32.mrb[28].mxu0 }
 0x2c2   : > { %v1122_v27 = vadd.f32 %v1541_v26, %v1966_v2  ;;  %v1113_v28 = vpop.f32.mrb[29].mxu0 }
 0x2c3   : > { %v1114_v30 = vadd.f32 %v1966_v2, %v1113_v28  ;;  %v1542_v31 = vpop.f32.mrb[30].mxu0 }
 0x2c4   : > { %1206 = vst [vmem:[%s1970_s21 + $0x70] sm:$0xff] %v1122_v27  ;;  %v1125_v32 = vadd.f32 %v1542_v31, %v1966_v2  ;;  %v1116_v33 = vpop.f32.mrb[31].mxu0 }
 0x2c5   : > { %1204 = vst [vmem:[%s1970_s21 + $0x60] sm:$0xff] %v1114_v30  ;;  %v1117_v34 = vadd.f32 %v1966_v2, %v1116_v33 }
 0x2c6   : > { %1207 = vst [vmem:[%s1970_s21 + $0x78] sm:$0xff] %v1125_v32 }
 0x2c7   : > { %1205 = vst [vmem:[%s1970_s21 + $0x68] sm:$0xff] %v1117_v34 }
 0x2c9   : > { %v1545_v35 = vpop.f32.mrb[32].mxu0 }
 0x2ca   : > { %v1138_v36 = vadd.f32 %v1545_v35, %v1966_v2  ;;  %v1129_v37 = vpop.f32.mrb[33].mxu0 }
 0x2cb   : > { %v1130_v38 = vadd.f32 %v1966_v2, %v1129_v37  ;;  %v1546_v39 = vpop.f32.mrb[34].mxu0 }
 0x2cc   : > { %1210 = vst [vmem:[%s1970_s21 + $0x90] sm:$0xff] %v1138_v36  ;;  %v1141_v40 = vadd.f32 %v1546_v39, %v1966_v2  ;;  %v1132_v41 = vpop.f32.mrb[35].mxu0 }
 0x2cd   : > { %1208 = vst [vmem:[%s1970_s21 + $0x80] sm:$0xff] %v1130_v38  ;;  %v1133_v42 = vadd.f32 %v1966_v2, %v1132_v41 }
 0x2ce   : > { %1211 = vst [vmem:[%s1970_s21 + $0x98] sm:$0xff] %v1141_v40 }
 0x2cf   : > { %1209 = vst [vmem:[%s1970_s21 + $0x88] sm:$0xff] %v1133_v42 }
 0x2d1   : > { %v1549_v43 = vpop.f32.mrb[36].mxu0 }
 0x2d2   : > { %v1154_v44 = vadd.f32 %v1549_v43, %v1966_v2  ;;  %v1145_v45 = vpop.f32.mrb[37].mxu0 }
 0x2d3   : > { %v1146_v46 = vadd.f32 %v1966_v2, %v1145_v45  ;;  %v1550_v47 = vpop.f32.mrb[38].mxu0 }
 0x2d4   : > { %1214 = vst [vmem:[%s1970_s21 + $0xb0] sm:$0xff] %v1154_v44  ;;  %v1157_v48 = vadd.f32 %v1550_v47, %v1966_v2  ;;  %v1148_v49 = vpop.f32.mrb[39].mxu0 }
 0x2d5   : > { %1212 = vst [vmem:[%s1970_s21 + $0xa0] sm:$0xff] %v1146_v46  ;;  %v1149_v50 = vadd.f32 %v1966_v2, %v1148_v49 }
 0x2d6   : > { %1215 = vst [vmem:[%s1970_s21 + $0xb8] sm:$0xff] %v1157_v48 }
 0x2d7   : > { %1213 = vst [vmem:[%s1970_s21 + $0xa8] sm:$0xff] %v1149_v50 }
 0x2d9   : > { %v1553_v51 = vpop.f32.mrb[40].mxu0 }
 0x2da   : > { %v1170_v52 = vadd.f32 %v1553_v51, %v1966_v2  ;;  %v1161_v53 = vpop.f32.mrb[41].mxu0 }
 0x2db   : > { %v1162_v54 = vadd.f32 %v1966_v2, %v1161_v53  ;;  %v1554_v55 = vpop.f32.mrb[42].mxu0 }
 0x2dc   : > { %1218 = vst [vmem:[%s1970_s21 + $0xd0] sm:$0xff] %v1170_v52  ;;  %v1173_v56 = vadd.f32 %v1554_v55, %v1966_v2  ;;  %v1164_v57 = vpop.f32.mrb[43].mxu0 }
 0x2dd   : > { %1216 = vst [vmem:[%s1970_s21 + $0xc0] sm:$0xff] %v1162_v54  ;;  %v1165_v58 = vadd.f32 %v1966_v2, %v1164_v57 }
 0x2de   : > { %1219 = vst [vmem:[%s1970_s21 + $0xd8] sm:$0xff] %v1173_v56 }
 0x2df   : > { %1217 = vst [vmem:[%s1970_s21 + $0xc8] sm:$0xff] %v1165_v58 }
 0x2e1   : > { %v1557_v59 = vpop.f32.mrb[44].mxu0 }
 0x2e2   : > { %v1186_v60 = vadd.f32 %v1557_v59, %v1966_v2  ;;  %v1177_v61 = vpop.f32.mrb[45].mxu0 }
 0x2e3   : > { %v1178_v62 = vadd.f32 %v1966_v2, %v1177_v61  ;;  %v1558_v63 = vpop.f32.mrb[46].mxu0 }
 0x2e4   : > { %1222 = vst [vmem:[%s1970_s21 + $0xf0] sm:$0xff] %v1186_v60  ;;  %v1189_v0 = vadd.f32 %v1558_v63, %v1966_v2  ;;  %v1180_v1 = vpop.f32.mrb[47].mxu0 }
 0x2e5   : > { %1220 = vst [vmem:[%s1970_s21 + $0xe0] sm:$0xff] %v1178_v62  ;;  %v1181_v3 = vadd.f32 %v1966_v2, %v1180_v1 }
 0x2e6   : > { %1223 = vst [vmem:[%s1970_s21 + $0xf8] sm:$0xff] %v1189_v0 }
 0x2e7   : > { %1221 = vst [vmem:[%s1970_s21 + $0xe8] sm:$0xff] %v1181_v3 }
 0x2e8   : > { %1645 = shalt.err (!%p1642_p3)
}
 0x2e9   : > { %s1646_s20 = scalar_lea.hbm %s2035_s15, 4096  ;;  %s1650_s29 = scalar_lea.hbm %s2093_s7, 8192 }
 0x2ea   : > { %p1647_p4 = scmp.ne.s32.totalorder %s2035_s15, %s1646_s20  ;;  %p1651_p9 = scmp.lt.u32.totalorder %s2035_s15, %s2093_s7 }
 0x2eb   : > { %p1652_p10 = scmp.lt.u32.totalorder %s1650_s29, %s1646_s20  ;;  %p1654_p12 = scmp.lt.u32.totalorder %s1646_s20, %s2035_s15 }
 0x2ec   : > { %p1648_p7 = pnand %p1647_p4, %p1777_p5 }
 0x2ed   : > { %p1653_p11 = por %p1652_p10, %p1651_p9 }
 0x2ee   : > { %p1649_p8 = pneg %p1648_p7 }
 0x2ef   : > { %p1655_p13 = por %p1654_p12, %p1653_p11 }
 0x2f1   : > { %p1656_p0 = pnand %p1655_p13, %p1649_p8 }
 0x2f3   : > { %1659 = shalt.err (!%p1656_p0)
}
 0x2f4   : > { %s1697_s13 = smov 128   ;;  %s1698_s14 = smov 8  }
 0x2f5   : > { %1563 = dma.vmem_to_hbm [thread:$0]  (%p1777_p5), %s2037_s9, 4096, %s2035_s15, %s2045_s28, %s1697_s13, %s1697_s13, %s1698_s14  }
 0x2f6 PF: > { %p1569_p1 = scmp.ge.s32.totalorder %s1694_s27, 2  ;;  %s1253_s16 = sand.u32 1, %s1682_s24  }
 0x2f7   : > { %s1254_s17 = scalar_lea.sflag [#allocation3], %s1253_s16 }
 0x2f8   : > { %p1566_p2 = pnand %p1569_p1, %p1781_p6 }
 0x2fa   : > { %1677 = dma.done.wait (!%p1566_p2), %s1254_s17, 4096  }
 0x2fb   : > { %1679 = vsyncadd (!%p1566_p2), %s1254_s17, 4294963200  ;;  %p17_p3 = scmp.ge.s32.totalorder %s1764_s30, 4   ;;  %s2096_s24 = smov %s1686_s25 }
 0x2fc   : > { %s2097_s25 = smov %s1690_s26  ;;  %s2098_s26 = smov %s1775_s10 }
 0x2fd   : > { %s2099_s27 = smov %s1764_s30  ;;  %19 = sbr.rel (!%p17_p3) target bundleno = 3 (0x3), region = 83 }
 0x304   :  { %1259 = vsyncpa [#allocation3], 1 }
 0x305   :  { %1261 = vsyncpa [#allocation3 + $0x1], 1 }

</bundles_post_ra>
